<compile_context>
chip_gen: v6e
topology: v6e:2x2x1
jax: 0.10.0
libtpu: 0.0.40
codegen_flags: <defaults>
</compile_context>

<pallas_src>
import functools

import jax
import jax.numpy as jnp
from jax.experimental import pallas as pl
from jax.experimental.pallas import tpu as pltpu


def _round_up(x: int, m: int) -> int:
    return ((x + m - 1) // m) * m


def _pipeline_mode_supported() -> bool:
    """One-time feature check (replaces the old broad try/except fallback):
    does this jax's pl.BlockSpec accept pipeline_mode=pl.Buffered(...)?"""
    if not hasattr(pl, "Buffered"):
        return False
    try:
        pl.BlockSpec((8, 128), lambda i: (0, 0),
                     pipeline_mode=pl.Buffered(buffer_count=1))
        return True
    except TypeError:
        return False


_HAS_PIPELINE_MODE = _pipeline_mode_supported()


def _self_output_kernel(x_ref, wt_ref, b_ref, g_ref, beta_ref, o_ref, *, eps):
    # x_ref:    (TM, H) activations tile in the caller's dtype (f32 or bf16).
    # wt_ref:   (H, H)  bf16 dense weight, pre-transposed (in_features, out_features)
    # b_ref:    (1, H)  f32 dense bias
    # g_ref:    (1, H)  f32 LayerNorm gamma
    # beta_ref: (1, H)  f32 LayerNorm beta

    # Cast to the MXU compute dtype INSIDE the kernel (no extra wrapper-side
    # HBM pass); no-op if the caller already supplies bf16 activations.
    x = x_ref[...].astype(wt_ref.dtype)

    # Dense on the MXU: bf16 operands, f32 accumulation.
    y = jnp.dot(x, wt_ref[...], preferred_element_type=jnp.float32)
    y = y + b_ref[...]  # bias add in f32

    # Dropout -> identity (inference).  # TODO(synk): training-mode dropout mask.

    # LayerNorm over the last dim.  Two-pass variance (y - mean)^2 for better
    # numerics; the extra VPU pass co-issues for free under MXU/DMA slack.
    inv_h = 1.0 / y.shape[-1]
    mean = jnp.sum(y, axis=-1, keepdims=True) * inv_h
    d = y - mean
    var = jnp.sum(d * d, axis=-1, keepdims=True) * inv_h
    inv = jax.lax.rsqrt(var + eps)
    o_ref[...] = (d * inv * g_ref[...] + beta_ref[...]).astype(o_ref.dtype)


def prepare_self_output_params(params, compute_dtype=jnp.bfloat16):
    """One-time parameter prep (hoisted OUT of the per-forward path):
    pre-transpose the dense weight to (in_features, out_features) and cast the
    matmul operand to the MXU compute dtype.  Bias / LayerNorm params stay f32
    so the bias add and normalization statistics never drop below f32."""
    h = params["dense_w"].shape[0]
    return {
        "dense_wt": jnp.asarray(params["dense_w"]).T.astype(compute_dtype),
        "dense_b": jnp.asarray(params["dense_b"], jnp.float32).reshape(1, h),
        "ln_g": jnp.asarray(params["ln_g"], jnp.float32).reshape(1, h),
        "ln_b": jnp.asarray(params["ln_b"], jnp.float32).reshape(1, h),
    }


def _fused_call(x2d, wt, b, g, beta, *, tile, eps, out_dtype, vmem_limit_bytes,
                single_buffer_constants, io_buffers):
    m, h = x2d.shape
    out_dtype = jnp.dtype(out_dtype)
    grid = pl.cdiv(m, tile)  # ragged last block is masked by Pallas (no jnp.pad)

    # Constants (W^T, bias, gamma, beta) are constant-index across the grid ->
    # single pipeline buffer each (pure VMEM saving, most valuable on v7x).
    const_kwargs = ({"pipeline_mode": pl.Buffered(buffer_count=1)}
                    if single_buffer_constants else {})
    # Optional deeper prefetch on the streaming x/out specs only (v6e knob).
    io_kwargs = ({"pipeline_mode": pl.Buffered(buffer_count=io_buffers)}
                 if (io_buffers is not None and _HAS_PIPELINE_MODE) else {})

    # Advisory cost hint for XLA scheduling around this custom call.
    cost = pl.CostEstimate(
        flops=2 * m * h * h,
        transcendentals=m,  # one rsqrt per token row
        bytes_accessed=(m * h * x2d.dtype.itemsize      # activations in
                        + m * h * out_dtype.itemsize    # output
                        + h * h * wt.dtype.itemsize     # resident weight
                        + 3 * h * 4),                   # bias / gamma / beta
    )

    kernel = functools.partial(_self_output_kernel, eps=eps)
    return pl.pallas_call(
        kernel,
        out_shape=jax.ShapeDtypeStruct((m, h), out_dtype),
        grid_spec=pltpu.PrefetchScalarGridSpec(
            num_scalar_prefetch=0,
            grid=(grid,),
            in_specs=[
                pl.BlockSpec((tile, h), lambda i: (i, 0), **io_kwargs),     # x tile
                pl.BlockSpec((h, h), lambda i: (0, 0), **const_kwargs),     # W^T
                pl.BlockSpec((1, h), lambda i: (0, 0), **const_kwargs),     # bias
                pl.BlockSpec((1, h), lambda i: (0, 0), **const_kwargs),     # gamma
                pl.BlockSpec((1, h), lambda i: (0, 0), **const_kwargs),     # beta
            ],
            out_specs=pl.BlockSpec((tile, h), lambda i: (i, 0), **io_kwargs),
        ),
        compiler_params=pltpu.CompilerParams(
            dimension_semantics=("parallel",),
            vmem_limit_bytes=vmem_limit_bytes,
        ),
        cost_estimate=cost,
    )(x2d, wt, b, g, beta)


def roberta_no_residual_self_output(hidden_states, input_tensor, prepared_params,
                                    *, eps=1e-12, token_tile=1024, out_dtype=None,
                                    min_grid_steps=2, io_buffers=None,
                                    deterministic=True,
                                    vmem_limit_bytes=48 * 1024 * 1024):
    """hidden_states, input_tensor: [B, S, H]; input_tensor is unused (no residual).
    `prepared_params` comes from prepare_self_output_params().

    token_tile: rows of the tokens-major [B*S, H] matrix per grid step.
      Default 1024 (512-2048 all good): big enough to amortize the ~0.35 us
      per-step overhead on v6e/v7x, still only ~18 MiB of double-buffered VMEM
      at H=1024 with f32 in/out.  v5e only needs a multiple of 128 rows
      (compute-bound at H>=768), so 512 is already sufficient there.
    out_dtype: output dtype; defaults to hidden_states.dtype.  Pass
      jnp.bfloat16 on HBM-bound v6e to halve writeback bytes / output buffers.
    min_grid_steps: lower bound on grid steps so v7x's two TensorCores both
      get work (raise to 8-16 in production where B*S is large).
    io_buffers: optional pipeline depth (e.g. 3) for the streaming x/out specs
      only, if xprof shows exposed DMA on v6e.
    vmem_limit_bytes: scoped-VMEM request (v5e default scoped VMEM is only
      ~16 MiB, so pass this explicitly; 48 MiB leaves headroom under v7x's
      64 MiB physical VMEM).
    """
    del input_tensor  # module ignores it (no residual connection)
    if not deterministic:
        # TODO(synk): training-mode dropout (pltpu.prng_random_bits mask) not emitted.
        raise NotImplementedError("only deterministic (inference) dropout is supported")

    b_, s_, h = hidden_states.shape
    m = b_ * s_
    wt = prepared_params["dense_wt"]
    assert wt.shape == (h, h)
    out_dtype = jnp.dtype(hidden_states.dtype if out_dtype is None else out_dtype)

    # Activations go to the kernel in their native dtype; the bf16 cast for the
    # MXU happens inside the kernel body (no extra XLA pass over HBM).
    x2d = hidden_states.reshape(m, h)

    # ---- tile selection --------------------------------------------------
    # Start from token_tile, never exceed the (8-rounded) problem size.
    tile = max(8, min(token_tile, _round_up(m, 8)))

    # v7x: keep >= min_grid_steps grid steps so both TensorCores get work.
    steps = -(-m // tile)
    if steps < min_grid_steps and m >= 8 * min_grid_steps:
        tile = _round_up(-(-m // min_grid_steps), 8)

    # VMEM budget guard: 2*(x tile) + 2*(out tile) + resident W^T must stay
    # comfortably under vmem_limit_bytes (leave ~40% headroom for temporaries).
    budget = int(vmem_limit_bytes * 0.6)
    weight_bytes = h * h * wt.dtype.itemsize
    per_row = 2 * h * x2d.dtype.itemsize + 2 * h * out_dtype.itemsize
    max_tile = max(8, ((budget - weight_bytes) // per_row) // 8 * 8)
    tile = max(8, min(tile, max_tile))

    out2d = _fused_call(
        x2d, wt, prepared_params["dense_b"], prepared_params["ln_g"],
        prepared_params["ln_b"], tile=tile, eps=eps, out_dtype=out_dtype,
        vmem_limit_bytes=vmem_limit_bytes,
        single_buffer_constants=_HAS_PIPELINE_MODE, io_buffers=io_buffers)

    return out2d.reshape(b_, s_, h)


def _reference(hidden_states, params, eps):
    """Pure-JAX reference mirroring the kernel numerics: bf16 matmul operands,
    f32 accumulation, f32 two-pass LayerNorm."""
    b_, s_, h = hidden_states.shape
    x = hidden_states.reshape(-1, h).astype(jnp.bfloat16).astype(jnp.float32)
    w = params["dense_w"].astype(jnp.bfloat16).astype(jnp.float32)
    y = jnp.dot(x, w.T, precision=jax.lax.Precision.HIGHEST) + params["dense_b"]
    mean = jnp.mean(y, axis=-1, keepdims=True)
    var = jnp.mean((y - mean) ** 2, axis=-1, keepdims=True)
    out = (y - mean) * jax.lax.rsqrt(var + eps) * params["ln_g"] + params["ln_b"]
    return out.reshape(b_, s_, h).astype(hidden_states.dtype)


if __name__ == "__main__":
    # Small but lane-aligned shapes: hidden=128 exercises the unmasked 128-lane
    # store path (real RoBERTa is H=768); batch=2, seq=8 keeps it tiny.
    B, S, H = 2, 8, 128
    eps = 1e-12  # roberta layer_norm_eps

    key = jax.random.PRNGKey(0)
    k1, k2, k3, k4, k5, k6 = jax.random.split(key, 6)

    # Deterministic synthetic parameters (shapes per nn.Linear(H,H) / nn.LayerNorm(H)).
    params = {
        "dense_w": jax.random.normal(k1, (H, H), jnp.float32) * 0.02,
        "dense_b": jax.random.normal(k2, (H,), jnp.float32) * 0.02,
        "ln_g": 1.0 + 0.1 * jax.random.normal(k3, (H,), jnp.float32),
        "ln_b": 0.1 * jax.random.normal(k4, (H,), jnp.float32),
    }
    hidden_states = jax.random.normal(k5, (B, S, H), jnp.float32)
    input_tensor = jax.random.normal(k6, (B, S, H), jnp.float32)  # unused (no residual)

    prepared = prepare_self_output_params(params)  # one-time prep, out of the forward path
    out = roberta_no_residual_self_output(hidden_states, input_tensor, prepared, eps=eps)
    out = jax.block_until_ready(out)

    ref = _reference(hidden_states, params, eps)
    assert out.shape == (B, S, H)
    assert jnp.allclose(out, ref, atol=1e-2, rtol=1e-2), (
        "mismatch vs reference: max abs err "
        f"{jnp.max(jnp.abs(out.astype(jnp.float32) - ref.astype(jnp.float32)))}")

    print("KERNEL_OK")
</pallas_src>

<mosaic_0001>
module attributes {stable_mosaic.version = 11 : i64} {
  func.func @_self_output_kernel(%arg0: i32, %arg1: memref<8x128xf32, #tpu.memory_space<vmem>>, %arg2: memref<128x128xbf16, #tpu.memory_space<vmem>>, %arg3: memref<1x128xf32, #tpu.memory_space<vmem>>, %arg4: memref<1x128xf32, #tpu.memory_space<vmem>>, %arg5: memref<1x128xf32, #tpu.memory_space<vmem>>, %arg6: memref<8x128xf32, #tpu.memory_space<vmem>>) attributes {dimension_semantics = [#tpu.dimension_semantics<parallel>], iteration_bounds = array<i64: 2>, scalar_prefetch = 0 : i64, scratch_operands = 0 : i64, tpu.core_type = #tpu.core_type<tc>, window_params = [{transform_indices = @transform_0, window_bounds = array<i64: 8, 128>}, {pipeline_mode = #tpu.pipeline_mode<synchronous>, transform_indices = @transform_1, window_bounds = array<i64: 128, 128>}, {pipeline_mode = #tpu.pipeline_mode<synchronous>, transform_indices = @transform_2, window_bounds = array<i64: 1, 128>}, {pipeline_mode = #tpu.pipeline_mode<synchronous>, transform_indices = @transform_3, window_bounds = array<i64: 1, 128>}, {pipeline_mode = #tpu.pipeline_mode<synchronous>, transform_indices = @transform_4, window_bounds = array<i64: 1, 128>}, {transform_indices = @transform_5, window_bounds = array<i64: 8, 128>}]} {
    %c0 = arith.constant 0 : index
    %c0_0 = arith.constant 0 : index
    %0 = vector.load %arg1[%c0, %c0_0] : memref<8x128xf32, #tpu.memory_space<vmem>>, vector<8x128xf32>
    %1 = arith.truncf %0 : vector<8x128xf32> to vector<8x128xbf16>
    %c0_1 = arith.constant 0 : index
    %c0_2 = arith.constant 0 : index
    %2 = vector.load %arg2[%c0_1, %c0_2] : memref<128x128xbf16, #tpu.memory_space<vmem>>, vector<128x128xbf16>
    %cst = arith.constant dense<0.000000e+00> : vector<8x128xf32>
    %3 = tpu.matmul %1, %2, %cst {dimension_numbers = #tpu.dot_dimension_numbers<[1], [0], [0], [1], [0, 0, 1, 1], [], []>} : vector<8x128xbf16>, vector<128x128xbf16>, vector<8x128xf32> -> vector<8x128xf32>
    %c0_3 = arith.constant 0 : index
    %c0_4 = arith.constant 0 : index
    %4 = vector.load %arg3[%c0_3, %c0_4] : memref<1x128xf32, #tpu.memory_space<vmem>>, vector<1x128xf32>
    %5 = vector.broadcast %4 : vector<1x128xf32> to vector<8x128xf32>
    %6 = arith.addf %3, %5 : vector<8x128xf32>
    %cst_5 = arith.constant dense<0.000000e+00> : vector<8xf32>
    %7 = vector.multi_reduction <add>, %6, %cst_5 [1] : vector<8x128xf32> to vector<8xf32>
    %8 = vector.shape_cast %7 : vector<8xf32> to vector<8x1xf32>
    %cst_6 = arith.constant 7.812500e-03 : f32
    %9 = vector.broadcast %cst_6 : f32 to vector<8x1xf32>
    %10 = arith.mulf %8, %9 : vector<8x1xf32>
    %11 = vector.broadcast %10 : vector<8x1xf32> to vector<8x128xf32>
    %12 = arith.subf %6, %11 : vector<8x128xf32>
    %13 = arith.mulf %12, %12 : vector<8x128xf32>
    %cst_7 = arith.constant dense<0.000000e+00> : vector<8xf32>
    %14 = vector.multi_reduction <add>, %13, %cst_7 [1] : vector<8x128xf32> to vector<8xf32>
    %15 = vector.shape_cast %14 : vector<8xf32> to vector<8x1xf32>
    %cst_8 = arith.constant 7.812500e-03 : f32
    %16 = vector.broadcast %cst_8 : f32 to vector<8x1xf32>
    %17 = arith.mulf %15, %16 : vector<8x1xf32>
    %cst_9 = arith.constant 9.99999996E-13 : f32
    %18 = vector.broadcast %cst_9 : f32 to vector<8x1xf32>
    %19 = arith.addf %17, %18 : vector<8x1xf32>
    %20 = math.rsqrt %19 : vector<8x1xf32>
    %21 = vector.broadcast %20 : vector<8x1xf32> to vector<8x128xf32>
    %22 = arith.mulf %12, %21 : vector<8x128xf32>
    %c0_10 = arith.constant 0 : index
    %c0_11 = arith.constant 0 : index
    %23 = vector.load %arg4[%c0_10, %c0_11] : memref<1x128xf32, #tpu.memory_space<vmem>>, vector<1x128xf32>
    %24 = vector.broadcast %23 : vector<1x128xf32> to vector<8x128xf32>
    %25 = arith.mulf %22, %24 : vector<8x128xf32>
    %c0_12 = arith.constant 0 : index
    %c0_13 = arith.constant 0 : index
    %26 = vector.load %arg5[%c0_12, %c0_13] : memref<1x128xf32, #tpu.memory_space<vmem>>, vector<1x128xf32>
    %27 = vector.broadcast %26 : vector<1x128xf32> to vector<8x128xf32>
    %28 = arith.addf %25, %27 : vector<8x128xf32>
    %c0_14 = arith.constant 0 : index
    %c0_15 = arith.constant 0 : index
    %29 = vector.load %arg6[%c0_14, %c0_15] : memref<8x128xf32, #tpu.memory_space<vmem>>, vector<8x128xf32>
    tpu.vector_store %arg6[%c0_14, %c0_15], %28 {strides = array<i32>} : memref<8x128xf32, #tpu.memory_space<vmem>>, vector<8x128xf32>,
    return
  }
  func.func @transform_0(%arg0: i32) -> (i32, i32) {
    %c0_i32 = arith.constant 0 : i32
    %c0_i32_0 = arith.constant 0 : i32
    return %arg0, %c0_i32 : i32, i32
  }
  func.func @transform_1(%arg0: i32) -> (i32, i32) {
    %c0_i32 = arith.constant 0 : i32
    %c0_i32_0 = arith.constant 0 : i32
    %c0_i32_1 = arith.constant 0 : i32
    return %c0_i32, %c0_i32_0 : i32, i32
  }
  func.func @transform_2(%arg0: i32) -> (i32, i32) {
    %c0_i32 = arith.constant 0 : i32
    %c0_i32_0 = arith.constant 0 : i32
    %c0_i32_1 = arith.constant 0 : i32
    return %c0_i32, %c0_i32_0 : i32, i32
  }
  func.func @transform_3(%arg0: i32) -> (i32, i32) {
    %c0_i32 = arith.constant 0 : i32
    %c0_i32_0 = arith.constant 0 : i32
    %c0_i32_1 = arith.constant 0 : i32
    return %c0_i32, %c0_i32_0 : i32, i32
  }
  func.func @transform_4(%arg0: i32) -> (i32, i32) {
    %c0_i32 = arith.constant 0 : i32
    %c0_i32_0 = arith.constant 0 : i32
    %c0_i32_1 = arith.constant 0 : i32
    return %c0_i32, %c0_i32_0 : i32, i32
  }
  func.func @transform_5(%arg0: i32) -> (i32, i32) {
    %c0_i32 = arith.constant 0 : i32
    %c0_i32_0 = arith.constant 0 : i32
    return %arg0, %c0_i32 : i32, i32
  }
}

</mosaic_0001>

<bundles_post_ra>
// kernel: tpu_custom_call.1
= control target key start
LH: loop header
LB: loop body
LE: loop exit
PB: predicated region body
PF: predicated region fallthrough
CT: control target
= control target key end

     0   :  { %10 = vsyncpa [#allocation3], 0  ;;  %s944_s0 = inlined_call_operand.hbm [shape: f32[16,128], index: 0, kind: input, shape index: {}]   ;;  %s945_s1 = inlined_call_operand.hbm [shape: bf16[128,128], index: 1, kind: input, shape index: {}]   ;;  %s946_s2 = inlined_call_operand.vmem [shape: f32[1,128], index: 2, kind: input, shape index: {}]   ;;  %s947_s3 = inlined_call_operand.vmem [shape: f32[1,128], index: 3, kind: input, shape index: {}]   ;;  %s948_s4 = inlined_call_operand.vmem [shape: f32[1,128], index: 4, kind: input, shape index: {}]   ;;  %s949_s5 = inlined_call_operand.hbm [shape: f32[16,128], index: 5, kind: output, shape index: {}]  }
   0x1   :  { %12 = vsyncpa [#allocation3 + $0x1], 0 }
   0x2   :  { %13 = vsyncpa [#allocation6], 0 }
   0x3   :  { %14 = vsyncpa [#allocation4], 0 }
   0x4   :  { %16 = vsyncpa [#allocation4 + $0x1], 0  ;;  %s777_s18 = smov 0   ;;  %s779_s19 = smov 0  }
   0x5   :  { %s781_s20 = smov 0   ;;  %s783_s21 = smov 0  }
   0x6 LB: > { %s798_s22 = sadd.s32 4294967295, %s738_s21   ;;  %s491_s23 = sadd.s32 4294967294, %s738_s21   ;;  %s738_s21 = sphi %s783_s21, %s971_s21   ;;  %s734_s20 = sphi %s781_s20, %s970_s20   ;;  %s730_s19 = sphi %s779_s19, %s969_s19   ;;  %s726_s18 = sphi %s777_s18, %s968_s18  }
   0x7   : > { %p42_p0 = scmp.ne.s32.totalorder %s730_s19, %s726_s18  ;;  %p950_p1 = scmp.eq.s32.totalorder %s798_s22, 0 }
   0x8   : > { %p156_p3 = scmp.eq.s32.totalorder %s491_s23, 1  ;;  %p492_p5 = scmp.ge.s32.totalorder %s738_s21, 1 }
   0x9   : > { %p807_p4 = por %p950_p1, %p42_p0  ;;  %p163_p7 = scmp.lt.s32.totalorder %s738_s21, 3 }
   0xa   : > { %p812_p6 = por %p156_p3, %p42_p0  ;;  %s740_s27 = smov [#allocation5]  }
   0xb   : > { %s954_s24 = scalar_select %p807_p4, 1, 0 }
   0xc   : > { %s955_s25 = scalar_select %p812_p6, 1, 0 }
   0xd   : > { %p817_p8 = pnand %p492_p5, %p163_p7  ;;  %s175_s28 = sshll.u32 %s740_s27, 4  ;;  %s176_s28 = int_to_ptr.vmem [resolvable:$true] %s175_s28 }
   0xe   : > { %s831_s30 = sadd.s32 1, %s738_s21   ;;  %s29_s6 = sadd.s32 1, %s734_s20 }
   0xf   : > { %s956_s26 = scalar_select %p817_p8, 1, 0 }
  0x10   : > { %p553_p9 = pneg %p817_p8  ;;  %s26_s7 = ssub.s32 %s738_s21, %s831_s30 }
  0x11   : > { %s627_s8 = scalar_lea.vmem %s176_s28, 1024  ;;  %p635_p5 = scmp.lt.s32.totalorder %s176_s28, %s176_s28 }
  0x12   : > { %p826_p11 = pnand %p553_p9, %p950_p1  ;;  %p628_p13 = scmp.ne.s32.totalorder %s176_s28, %s627_s8 }
  0x13   : > { %p636_p7 = scmp.lt.s32.totalorder %s627_s8, %s627_s8 }
  0x14   : > { %p618_p12 = pneg %p826_p11 }
  0x15   : > { %p637_p10 = por %p636_p7, %p635_p5 }
  0x16   : > { %p630_p0 = pnand %p628_p13, %p618_p12 }
  0x18   : > { %p631_p3 = pneg %p630_p0 }
  0x1a   : > { %p638_p2 = pnand %p637_p10, %p631_p3 }
  0x1c   : > { %641 = shalt.err (!%p638_p2)
}
  0x1d   : > { %s741_s9 = smov 64   ;;  %s742_s10 = smov 4  }
  0x1e   : > { %556 = dma.hbm_to_vmem [thread:$0]  (!%p826_p11), %s945_s1, 1024, %s176_s28, [#allocation6], %s741_s9, %s741_s9, %s742_s10  }
  0x1f   : > { %p27_p9 = scmp.eq.s32.totalorder %s26_s7, 0  ;;  %p36_p12 = scmp.ne.s32.totalorder %s734_s20, %s730_s19 }
  0x20   : > { %p37_p10 = scmp.eq.s32.totalorder %s738_s21, 0  ;;  %p566_p2 = scmp.lt.s32.totalorder %s738_s21, 2 }
  0x21   : > { %s848_s13 = scalar_select %p27_p9, %s734_s20, %s29_s6  }
  0x22   : > { %p38_p13 = por %p37_p10, %p36_p12  ;;  %p958_p0 = scmp.eq.s32.totalorder %s798_s22, 1 }
  0x23   : > { %s198_s15 = sand.u32 1, %s734_s20   ;;  %s496_s16 = sshll.u32 %s738_s21, 7 }
  0x24   : > { %p852_p3 = por %p958_p0, %p36_p12  ;;  %s495_s17 = sshll.u32 %s198_s15, 3 }
  0x25   : > { %s861_s29 = scalar_lea.hbm %s944_s0, %s496_s16  ;;  %s202_s28 = scalar_lea.vmem [#allocation2], %s495_s17 }
  0x26   : > { %s959_s14 = scalar_select %p852_p3, 1, 0 }
  0x27   : > { %s209_s6 = sshll.u32 %s202_s28, 4  ;;  %p863_p11 = pnand %p566_p2, %p38_p13  ;;  %s210_s6 = int_to_ptr.vmem [resolvable:$true] %s209_s6 }
  0x28   : > { %s199_s8 = scalar_lea.sflag [#allocation3], %s198_s15  ;;  %s642_s9 = scalar_lea.hbm %s861_s29, 128 }
  0x29   : > { %p643_p5 = scmp.ne.s32.totalorder %s861_s29, %s642_s9  ;;  %p644_p7 = pneg %p863_p11 }
  0x2a   : > { %s647_s12 = scalar_lea.hbm %s944_s0, 256  ;;  %p648_p10 = scmp.lt.s32.totalorder %s861_s29, %s944_s0 }
  0x2b   : > { %p645_p9 = pnand %p644_p7, %p643_p5  ;;  %p649_p2 = scmp.lt.s32.totalorder %s647_s12, %s642_s9 }
  0x2d   : > { %p646_p12 = pneg %p645_p9  ;;  %p650_p13 = por %p649_p2, %p648_p10 }
  0x2f   : > { %p651_p0 = pnand %p650_p13, %p646_p12 }
  0x31   : > { %654 = shalt.err (!%p651_p0)
}
  0x32   : > { %s655_s23 = scalar_lea.vmem %s210_s6, 128  ;;  %s743_s15 = smov [#allocation2]  }
  0x33   : > { %p656_p1 = scmp.ne.s32.totalorder %s210_s6, %s655_s23  ;;  %s660_s27 = sshll.u32 %s743_s15, 4  ;;  %s661_s27 = int_to_ptr.vmem [resolvable:$false] %s660_s27 }
  0x34   : > { %s662_s28 = scalar_lea.vmem %s661_s27, 256  ;;  %p663_p5 = scmp.lt.s32.totalorder %s210_s6, %s661_s27 }
  0x35   : > { %p658_p6 = pnand %p656_p1, %p644_p7  ;;  %p664_p9 = scmp.lt.s32.totalorder %s662_s28, %s655_s23 }
  0x37   : > { %p659_p3 = pneg %p658_p6  ;;  %p665_p4 = por %p664_p9, %p663_p5 }
  0x39   : > { %p666_p8 = pnand %p665_p4, %p659_p3 }
  0x3b   : > { %669 = shalt.err (!%p666_p8)
}
  0x3c   : > { %560 = dma.hbm_to_vmem [thread:$0]  (!%p863_p11), %s861_s29, 128, %s210_s6, %s199_s8  }
  0x3d   : > { %p961_p12 = scmp.ne.s32.totalorder %s956_s26, 0 }
  0x3e   : > { %s884_s9 = sand.u32 (!%p961_p12), 1, %s730_s19   ;;  %p962_p1 = scmp.ne.s32.totalorder (!%p961_p12), %s954_s24, 0 }
  0x3f   : > { %218 = sbr.rel (%p961_p12) target bundleno = 619 (0x26b), region = 40  ;;  %s498_s10 = sshll.u32 (!%p961_p12), %s884_s9, 3 }
  0x40   : > { %s221_s11 = scalar_lea.sflag (!%p961_p12), [#allocation3], %s884_s9  ;;  %s224_s12 = scalar_lea.vmem (!%p961_p12), [#allocation2], %s498_s10 }
  0x44   : > { %713 = dma.done.wait (%p962_p1), %s221_s11, 128  }
  0x45   : > { %715 = vsyncadd (%p962_p1), %s221_s11, 4294967168  ;;  %p963_p4 = scmp.eq.s32.totalorder %s798_s22, 0 }
  0x47   : > { %717 = dma.done.wait (%p963_p4), [#allocation6], 1024   ;;  %p964_p6 = pmov %p963_p4 }
  0x48   : > { %v744_v0 = vmov 0.0   ;;  %vm745_vm0 = vmmov 0   ;;  %v606_v1 = vld [vmem:[#allocation5 + $0x38] sm:$0xff]   ;;  %v607_v2 = vld [vmem:[#allocation5 + $0x30] sm:$0xff]   ;;  %v608_v3 = vld [vmem:[#allocation5 + $0x28] sm:$0xff]   ;;  %s513_s16 = sshll.u32 %s798_s22, 7 }
  0x49   : > { %719 = vsyncadd (%p964_p6), [#allocation6], 4294966272  ;;  %525 = vmatprep.subr.bf16.mxu0 %v744_v0  ;;  %541 = vmatprep.mubr.msk.bf16.mxu0 %vm745_vm0, %v744_v0  ;;  %v609_v4 = vld [vmem:[#allocation5 + $0x20] sm:$0xff]   ;;  %v610_v5 = vld [vmem:[#allocation5 + $0x18] sm:$0xff]   ;;  %s254_s17 = scalar_lea.vmem [#allocation7], %s498_s10  ;;  %s409_s28 = scalar_lea.hbm %s949_s5, %s513_s16 }
  0x4a   : > { %526 = vmatpush3.bf16.msra.mxu0 %v606_v1  ;;  %v611_v6 = vld [vmem:[#allocation5 + $0x10] sm:$0xff]   ;;  %v612_v7 = vld [vmem:[#allocation5 + $0x8] sm:$0xff]   ;;  %v613_v8 = vld [vmem:[#allocation5] sm:$0xff]   ;;  %s411_s23 = sshll.u32 %s254_s17, 4  ;;  %s398_s11 = scalar_lea.sflag [#allocation4], %s884_s9  ;;  %s412_s23 = int_to_ptr.vmem [resolvable:$true] %s411_s23 }
  0x4b   : > { %527 = vmatprep.subr.bf16.mxu0 %v744_v0  ;;  %v256_v9 = vld [vmem:[%s224_s12] sm:$0xff]  ;;  %s670_s12 = scalar_lea.vmem %s412_s23, 128  ;;  %p965_p3 = scmp.ne.s32.totalorder %s959_s14, 0 }
  0x4c   : > { %v257_v10 = vpack.c.bf16 %v256_v9, %v256_v9  ;;  %v501_v11 = vld [vmem:[%s946_s2] ss:$0 sm:$0xff]  ;;  %p671_p8 = scmp.ne.s32.totalorder %s412_s23, %s670_s12  ;;  %s746_s24 = smov [#allocation7]  }
  0x4d   : > { %v510_v25 = vld [vmem:[%s947_s3] ss:$0 sm:$0xff]  ;;  %s674_s26 = sshll.u32 %s746_s24, 4  ;;  %s675_s26 = int_to_ptr.vmem [resolvable:$false] %s674_s26 }
  0x4e   : > { %528 = vmatpush3.bf16.msra.mxu0 %v607_v2  ;;  %v511_v27 = vld [vmem:[%s948_s4] ss:$0 sm:$0xff]  ;;  %p672_p11 = pnand %p671_p8, %p965_p3  ;;  %s676_s22 = scalar_lea.vmem %s675_s26, 256 }
  0x4f   : > { %529 = vmatprep.subr.bf16.mxu0 %v744_v0  ;;  %p677_p10 = scmp.lt.s32.totalorder %s412_s23, %s675_s26  ;;  %p678_p2 = scmp.lt.s32.totalorder %s676_s22, %s670_s12 }
  0x50   : > { %p673_p7 = pneg %p672_p11 }
  0x51   : > { %p679_p13 = por %p678_p2, %p677_p10 }
  0x52   : > { %530 = vmatpush3.bf16.msra.mxu0 %v608_v3 }
  0x53   : > { %531 = vmatprep.subr.bf16.mxu0 %v744_v0  ;;  %p680_p0 = pnand %p679_p13, %p673_p7 }
  0x56   : > { %532 = vmatpush3.bf16.msra.mxu0 %v609_v4 }
  0x57   : > { %533 = vmatprep.subr.bf16.mxu0 %v744_v0 }
  0x5a   : > { %534 = vmatpush3.bf16.msra.mxu0 %v610_v5 }
  0x5b   : > { %535 = vmatprep.subr.bf16.mxu0 %v744_v0 }
  0x5e   : > { %536 = vmatpush3.bf16.msra.mxu0 %v611_v6 }
  0x5f   : > { %537 = vmatprep.subr.bf16.mxu0 %v744_v0 }
  0x62   : > { %538 = vmatpush3.bf16.msra.mxu0 %v612_v7 }
  0x63   : > { %539 = vmatprep.subr.bf16.mxu0 %v744_v0 }
  0x66   : > { %540 = vmatpush3.bf16.msra.mxu0 %v613_v8 }
  0x69   : > { %542 = vmatmul.mubr.bf16.vlgmr.msra.gmra.mxu0 %v257_v10 }
 0x129   : > { %v363_v12 = vpop.f32.mrf.mxu0 }
 0x12a   : > { %v364_v13 = vadd.f32 %v501_v11, %v363_v12 }
 0x12b   : > { %v543_v14 = vpop.f32.mrf.mxu0 }
 0x12c   : > { %369 = vadd.xlane.f32.xlu0 %v364_v13 }
 0x12d   : > { %v366_v15 = vpop.f32.mrf.mxu0 }
 0x12f   : > { %v544_v16 = vpop.f32.mrf.mxu0 }
 0x1b5   : > { %v370_v17 = vpop.xlane.xlu0 %369 }
 0x1b6   : > { %v371_v18 = vmul.f32 0.0078125, %v370_v17 }
 0x1b8   : > { %v372_v19 = vsub.f32 %v364_v13, %v371_v18 }
 0x1ba   : > { %v373_v20 = vmul.f32 %v372_v19, %v372_v19 }
 0x1bc   : > { %374 = vadd.xlane.f32.xlu0 %v373_v20 }
 0x245   : > { %v375_v21 = vpop.xlane.xlu0 %374 }
 0x246   : > { %v376_v22 = vmul.f32 0.0078125, %v375_v21 }
 0x248   : > { %v377_v23 = vadd.f32 1e-12, %v376_v22 }
 0x24a   : > { %614 = vrsqrt.f32 %v377_v23 }
 0x257   : > { %v615_v24 = vpop.eup %614 }
 0x258   : > { %v379_v26 = vmul.f32 %v615_v24, %v372_v19 }
 0x25a   : > { %v387_v28 = vmul.f32 %v510_v25, %v379_v26 }
 0x25c   : > { %v395_v29 = vadd.f32 %v511_v27, %v387_v28 }
 0x25e   : > { %396 = vst [vmem:[%s254_s17] sm:$0xff] %v395_v29 }
 0x25f   : > { %683 = shalt.err (!%p680_p0)
}
 0x260   : > { %s684_s10 = scalar_lea.hbm %s409_s28, 128  ;;  %s688_s6 = scalar_lea.hbm %s949_s5, 256 }
 0x261   : > { %p685_p5 = scmp.ne.s32.totalorder %s409_s28, %s684_s10  ;;  %p689_p1 = scmp.lt.s32.totalorder %s409_s28, %s949_s5 }
 0x262   : > { %p690_p4 = scmp.lt.s32.totalorder %s688_s6, %s684_s10 }
 0x263   : > { %p686_p9 = pnand %p685_p5, %p965_p3 }
 0x264   : > { %p691_p6 = por %p690_p4, %p689_p1 }
 0x265   : > { %p687_p12 = pneg %p686_p9 }
 0x267   : > { %p692_p8 = pnand %p691_p6, %p687_p12 }
 0x269   : > { %695 = shalt.err (!%p692_p8)
}
 0x26a   : > { %551 = dma.vmem_to_hbm [thread:$0]  (%p965_p3), %s412_s23, 128, %s409_s28, %s398_s11  }
 0x26b PF: > { %s423_s16 = sand.u32 1, %s726_s18   ;;  %p966_p11 = scmp.ne.s32.totalorder %s955_s25, 0 }
 0x26c   : > { %p967_p7 = scmp.ge.s32.totalorder %s738_s21, 2  ;;  %s424_s17 = scalar_lea.sflag [#allocation4], %s423_s16 }
 0x26e   : > { %p562_p10 = pnand %p967_p7, %p966_p11 }
 0x270   : > { %p563_p2 = pneg %p562_p10 }
 0x272   : > { %721 = dma.done.wait (%p563_p2), %s424_s17, 128  }
 0x273   : > { %723 = vsyncadd (%p563_p2), %s424_s17, 4294967168  ;;  %p19_p13 = scmp.ge.s32.totalorder %s831_s30, 4   ;;  %s968_s18 = smov %s730_s19 }
 0x274   : > { %s969_s19 = smov %s734_s20  ;;  %s970_s20 = smov %s848_s13 }
 0x275   : > { %s971_s21 = smov %s831_s30  ;;  %21 = sbr.rel (!%p19_p13) target bundleno = 6 (0x6), region = 89 }
 0x27a   :  { %429 = vsyncpa [#allocation3], 1 }
 0x27b   :  { %431 = vsyncpa [#allocation3 + $0x1], 1 }
 0x27c   :  { %432 = vsyncpa [#allocation6], 1 }
 0x27d   :  { %433 = vsyncpa [#allocation4], 1 }
 0x27e   :  { %435 = vsyncpa [#allocation4 + $0x1], 1 }

</bundles_post_ra>
